<compile_context>
chip_gen: v5e
topology: v5e:2x2
jax: 0.10.0
libtpu: 0.0.40
codegen_flags: <defaults>
</compile_context>

<pallas_src>
import functools

import jax
import jax.numpy as jnp
from jax.experimental import pallas as pl
from jax.experimental.pallas import tpu as pltpu


# ----------------------------------------------------------------------------
# Kernel
# ----------------------------------------------------------------------------
def _focal_loss_kernel(x_ref, t_ref, out_ref, *, gamma, tile_rows, lanes,
                       tiles_per_core, valid_rows):
    c = pl.program_id(0)   # core-parallel axis (size 1 on v5e/v6e, 2 on v7x)
    i = pl.program_id(1)   # sequential (reduction) axis

    @pl.when(i == 0)
    def _():
        out_ref[...] = jnp.zeros_like(out_ref)

    # Unclamped global row offset of this step's tile.  Duplicate (clamped)
    # tiles produced by ceil-rounding on the core axis get
    # row_base >= valid_rows and are skipped entirely.
    row_base = (c * tiles_per_core + i) * tile_rows
    is_full = row_base + tile_rows <= valid_rows
    in_range = row_base < valid_rows

    # ---- per-element focal loss (always computed; the grid exists for it) --
    x = x_ref[...].astype(jnp.float32)
    t = t_ref[...].astype(jnp.float32)

    # BCEWithLogitsLoss(reduction='none'), numerically stable form:
    #   max(x, 0) - x*t + log1p(exp(-|x|))
    bce = jnp.maximum(x, 0.0) - x * t + jnp.log1p(jnp.exp(-jnp.abs(x)))
    one_minus_pt = 1.0 - jnp.exp(-bce)

    # Focal modulation (1 - pt) ** gamma.  Integer gamma (common case, 2)
    # uses plain VPU multiplies instead of pow == exp(gamma * log(.)).
    g = float(gamma)
    if g.is_integer() and 0 <= int(g) <= 8:
        gi = int(g)
        if gi == 0:
            f_loss = bce
        else:
            mod = one_minus_pt
            for _ in range(gi - 1):
                mod = mod * one_minus_pt
            f_loss = mod * bce
    else:
        # Clamp: rounding could make (1 - pt) slightly negative -> NaN in pow.
        f_loss = jnp.power(jnp.maximum(one_minus_pt, 0.0),
                           jnp.float32(g)) * bce

    def fold(v):
        # Cheap elementwise fold down to one vreg-shaped (8, lanes) partial;
        # the single cross-lane reduction happens outside the kernel.
        return v.reshape(tile_rows // 8, 8, lanes).sum(axis=0)

    # Steady-state path: no mask work at all.
    @pl.when(is_full)
    def _():
        out_ref[...] += fold(f_loss)

    # Boundary tile only: mask rows past the valid region (partial last block
    # gives undefined data in the out-of-bounds rows).
    @pl.when(jnp.logical_and(in_range, jnp.logical_not(is_full)))
    def _():
        row_ids = jax.lax.broadcasted_iota(jnp.int32, (tile_rows, lanes), 0)
        masked = jnp.where(row_base + row_ids < valid_rows, f_loss, 0.0)
        out_ref[...] += fold(masked)


# ----------------------------------------------------------------------------
# Helpers
# ----------------------------------------------------------------------------
def _device_kind():
    try:
        return jax.devices()[0].device_kind.lower()
    except Exception:
        return ""


def _default_num_cores():
    # Only v7x exposes two TensorCores to a single Pallas kernel; on 1-TC
    # chips (v5e/v6e) a size-2 core axis is pure loop overhead.
    return 2 if "v7" in _device_kind() else 1


def _input_buffer_count():
    kind = _device_kind()
    if "v5 lite" in kind or "v5e" in kind or "v5litepod" in kind:
        return 3   # HBM-bound v5e: deeper input buffering hides DMA jitter.
    return 2


def _focal_elems(x, t, gamma):
    """Plain-jnp per-element focal loss (used for the <1024-element tail)."""
    x = x.astype(jnp.float32)
    t = t.astype(jnp.float32)
    bce = jnp.maximum(x, 0.0) - x * t + jnp.log1p(jnp.exp(-jnp.abs(x)))
    one_minus_pt = jnp.maximum(1.0 - jnp.exp(-bce), 0.0)
    return jnp.power(one_minus_pt, jnp.float32(gamma)) * bce


# ----------------------------------------------------------------------------
# Wrapper
# ----------------------------------------------------------------------------
def focal_loss(inputs, targets, alpha=1.0, gamma=2.0, *,
               tile_rows=2048, num_cores=None):
    """Pallas implementation of FocalLoss.forward (returns a scalar mean)."""
    assert inputs.shape == targets.shape
    total_n = int(inputs.size)

    lanes = 128
    sub = 8
    chunk = sub * lanes                       # 1024

    flat_x = inputs.reshape(-1)
    flat_t = targets.reshape(-1)

    if num_cores is None:
        num_cores = _default_num_cores()

    rows_main = (total_n // chunk) * sub      # multiple of 8
    main_n = rows_main * lanes                # multiple of 1024
    tail_n = total_n - main_n                 # < 1024

    total_sum = jnp.float32(0.0)

    if main_n > 0:
        if main_n == total_n:
            # Aligned size: reshape is a free bitcast, zero extra HBM traffic.
            x2d = flat_x.reshape(rows_main, lanes)
            t2d = flat_t.reshape(rows_main, lanes)
        else:
            # Ragged size: only the aligned prefix goes through the kernel;
            # the small remainder is reduced with jnp below (no full-array
            # pad + copy as before).
            x2d = flat_x[:main_n].reshape(rows_main, lanes)
            t2d = flat_t[:main_n].reshape(rows_main, lanes)

        tr = min(int(tile_rows), rows_main)
        tr = max(sub, tr - (tr % sub))

        total_tiles = pl.cdiv(rows_main, tr)
        ncores = max(1, min(int(num_cores), total_tiles))
        tiles_per_core = pl.cdiv(total_tiles, ncores)
        last_block = total_tiles - 1

        def in_index_map(c, i, T=tiles_per_core, last=last_block):
            # Clamp so the DMA never goes past the array; clamped duplicate
            # tiles contribute nothing (their unclamped row_base is masked
            # out inside the kernel).
            return (jnp.minimum(c * T + i, last), 0)

        buffers = _input_buffer_count()
        if buffers != 2:
            def make_in_spec():
                return pl.BlockSpec((tr, lanes), in_index_map,
                                    pipeline_mode=pl.Buffered(buffers))
        else:
            def make_in_spec():
                return pl.BlockSpec((tr, lanes), in_index_map)

        kernel = functools.partial(
            _focal_loss_kernel,
            gamma=float(gamma),
            tile_rows=tr,
            lanes=lanes,
            tiles_per_core=tiles_per_core,
            valid_rows=rows_main,
        )

        bytes_accessed = (main_n * (x2d.dtype.itemsize + t2d.dtype.itemsize)
                          + ncores * sub * lanes * 4)

        partial_sums = pl.pallas_call(
            kernel,
            out_shape=jax.ShapeDtypeStruct((ncores * sub, lanes), jnp.float32),
            grid_spec=pltpu.PrefetchScalarGridSpec(
                num_scalar_prefetch=0,
                grid=(ncores, tiles_per_core),
                in_specs=[make_in_spec(), make_in_spec()],
                out_specs=pl.BlockSpec((sub, lanes), lambda c, i: (c, 0)),
            ),
            compiler_params=pltpu.CompilerParams(
                dimension_semantics=("parallel", "arbitrary"),
                # ~2-6 MiB of input buffers at the default tile size; well
                # under the limit on v5e/v6e (128 MiB phys) and v7x (64 MiB).
                vmem_limit_bytes=32 * 1024 * 1024,
            ),
            cost_estimate=pl.CostEstimate(
                flops=20 * main_n,
                transcendentals=3 * main_n,
                bytes_accessed=int(bytes_accessed),
            ),
        )(x2d, t2d)

        total_sum = total_sum + jnp.sum(partial_sums)

    if tail_n > 0:
        # <1024 elements: a few plain jnp ops, negligible cost.
        total_sum = total_sum + jnp.sum(
            _focal_elems(flat_x[main_n:], flat_t[main_n:], gamma))

    # alpha and 1/N folded into a single final scale.
    return total_sum * (jnp.float32(alpha) / jnp.float32(total_n))


# ----------------------------------------------------------------------------
# Pure-JAX reference (mirrors the PyTorch module)
# ----------------------------------------------------------------------------
def focal_loss_ref(inputs, targets, alpha=1.0, gamma=2.0):
    x = inputs.astype(jnp.float32)
    t = targets.astype(jnp.float32)
    bce = jnp.maximum(x, 0.0) - x * t + jnp.log1p(jnp.exp(-jnp.abs(x)))
    pt = jnp.exp(-bce)
    return jnp.mean(alpha * (1.0 - pt) ** gamma * bce)


if __name__ == "__main__":
    key = jax.random.PRNGKey(0)
    k1, k2, k3, k4 = jax.random.split(key, 4)

    # 1) Aligned NCHW-like example: batch=2, channels=4, spatial=16x16 (2048).
    shape = (2, 4, 16, 16)
    logits = jax.random.normal(k1, shape, dtype=jnp.float32)
    targets = (jax.random.uniform(k2, shape) > 0.5).astype(jnp.float32)

    out = jax.block_until_ready(focal_loss(logits, targets, alpha=1.0, gamma=2.0))
    ref = focal_loss_ref(logits, targets, alpha=1.0, gamma=2.0)
    assert jnp.allclose(out, ref, rtol=1e-5, atol=1e-6), (out, ref)

    # 1b) Native-dtype targets (bf16 hard labels) -- kernel upcasts in VMEM.
    out_bf = jax.block_until_ready(
        focal_loss(logits, targets.astype(jnp.bfloat16), alpha=1.0, gamma=2.0))
    assert jnp.allclose(out_bf, ref, rtol=1e-5, atol=1e-6), (out_bf, ref)

    # 2) Non-aligned size (378 elements): handled by the plain-jnp tail path.
    shape2 = (2, 3, 7, 9)
    logits2 = jax.random.normal(k3, shape2, dtype=jnp.float32)
    targets2 = (jax.random.uniform(k4, shape2) > 0.5).astype(jnp.float32)
    out2 = jax.block_until_ready(focal_loss(logits2, targets2, alpha=1.0, gamma=2.0))
    ref2 = focal_loss_ref(logits2, targets2, alpha=1.0, gamma=2.0)
    assert jnp.allclose(out2, ref2, rtol=1e-5, atol=1e-6), (out2, ref2)

    # 3) Multi-tile + partial boundary block + forced core axis + gamma=3:
    #    4*4*24*24 = 9216 elems -> 72 rows; tile_rows=16 -> 5 tiles, last
    #    block partial, and ncores=2 exercises the clamped-duplicate skip.
    k5, k6 = jax.random.split(k1)
    shape3 = (4, 4, 24, 24)
    logits3 = jax.random.normal(k5, shape3, dtype=jnp.float32)
    targets3 = (jax.random.uniform(k6, shape3) > 0.5).astype(jnp.float32)
    out3 = jax.block_until_ready(
        focal_loss(logits3, targets3, alpha=0.25, gamma=3.0,
                   tile_rows=16, num_cores=2))
    ref3 = focal_loss_ref(logits3, targets3, alpha=0.25, gamma=3.0)
    assert jnp.allclose(out3, ref3, rtol=1e-5, atol=1e-6), (out3, ref3)

    # 4) Non-integer gamma exercises the pow path. Plus a ragged size >= 1024
    #    (1430 elems) so both the kernel and the jnp tail contribute.
    k7, k8 = jax.random.split(k2)
    shape4 = (2, 5, 13, 11)
    logits4 = jax.random.normal(k7, shape4, dtype=jnp.float32)
    targets4 = (jax.random.uniform(k8, shape4) > 0.5).astype(jnp.float32)
    out4 = jax.block_until_ready(focal_loss(logits4, targets4, alpha=1.0, gamma=1.5))
    ref4 = focal_loss_ref(logits4, targets4, alpha=1.0, gamma=1.5)
    assert jnp.allclose(out4, ref4, rtol=1e-5, atol=1e-6), (out4, ref4)

    print("KERNEL_OK")
</pallas_src>

<mosaic_0001>
module attributes {stable_mosaic.version = 11 : i64} {
  func.func @_focal_loss_kernel(%arg0: i32, %arg1: i32, %arg2: memref<16x128xf32, #tpu.memory_space<vmem>>, %arg3: memref<16x128xf32, #tpu.memory_space<vmem>>, %arg4: memref<8x128xf32, #tpu.memory_space<vmem>>) attributes {dimension_semantics = [#tpu.dimension_semantics<parallel>, #tpu.dimension_semantics<arbitrary>], iteration_bounds = array<i64: 1, 1>, scalar_prefetch = 0 : i64, scratch_operands = 0 : i64, tpu.core_type = #tpu.core_type<tc>, window_params = [{transform_indices = @transform_0, window_bounds = array<i64: 16, 128>}, {transform_indices = @transform_1, window_bounds = array<i64: 16, 128>}, {transform_indices = @transform_2, window_bounds = array<i64: 8, 128>}]} {
    %c0_i32 = arith.constant 0 : i32
    %0 = arith.cmpi eq, %arg1, %c0_i32 : i32
    %1 = arith.extui %0 : i1 to i32
    %c0_i32_0 = arith.constant 0 : i32
    %2 = arith.cmpi ne, %1, %c0_i32_0 : i32
    scf.if %2 {
      %cst_12 = arith.constant 0.000000e+00 : f32
      %34 = vector.broadcast %cst_12 : f32 to vector<8x128xf32>
      %c0_13 = arith.constant 0 : index
      %c0_14 = arith.constant 0 : index
      %35 = vector.load %arg4[%c0_13, %c0_14] : memref<8x128xf32, #tpu.memory_space<vmem>>, vector<8x128xf32>
      tpu.vector_store %arg4[%c0_13, %c0_14], %34 {strides = array<i32>} : memref<8x128xf32, #tpu.memory_space<vmem>>, vector<8x128xf32>,
    } else {
    }
    %c1_i32 = arith.constant 1 : i32
    %3 = arith.muli %arg0, %c1_i32 : i32
    %4 = arith.addi %3, %arg1 : i32
    %c16_i32 = arith.constant 16 : i32
    %5 = arith.muli %4, %c16_i32 : i32
    %c16_i32_1 = arith.constant 16 : i32
    %6 = arith.addi %5, %c16_i32_1 : i32
    %c16_i32_2 = arith.constant 16 : i32
    %7 = arith.cmpi sle, %6, %c16_i32_2 : i32
    %c16_i32_3 = arith.constant 16 : i32
    %8 = arith.cmpi slt, %5, %c16_i32_3 : i32
    %c0 = arith.constant 0 : index
    %c0_4 = arith.constant 0 : index
    %9 = vector.load %arg2[%c0, %c0_4] : memref<16x128xf32, #tpu.memory_space<vmem>>, vector<16x128xf32>
    %c0_5 = arith.constant 0 : index
    %c0_6 = arith.constant 0 : index
    %10 = vector.load %arg3[%c0_5, %c0_6] : memref<16x128xf32, #tpu.memory_space<vmem>>, vector<16x128xf32>
    %cst = arith.constant 0.000000e+00 : f32
    %11 = vector.broadcast %cst : f32 to vector<16x128xf32>
    %12 = arith.maximumf %9, %11 : vector<16x128xf32>
    %13 = arith.mulf %9, %10 : vector<16x128xf32>
    %14 = arith.subf %12, %13 : vector<16x128xf32>
    %15 = math.absf %9 : vector<16x128xf32>
    %cst_7 = arith.constant 0.000000e+00 : f32
    %16 = vector.broadcast %cst_7 : f32 to vector<16x128xf32>
    %17 = arith.subf %16, %15 : vector<16x128xf32>
    %18 = math.exp %17 : vector<16x128xf32>
    %19 = math.log1p %18 : vector<16x128xf32>
    %20 = arith.addf %14, %19 : vector<16x128xf32>
    %cst_8 = arith.constant 0.000000e+00 : f32
    %21 = vector.broadcast %cst_8 : f32 to vector<16x128xf32>
    %22 = arith.subf %21, %20 : vector<16x128xf32>
    %23 = math.exp %22 : vector<16x128xf32>
    %cst_9 = arith.constant 1.000000e+00 : f32
    %24 = vector.broadcast %cst_9 : f32 to vector<16x128xf32>
    %25 = arith.subf %24, %23 : vector<16x128xf32>
    %26 = arith.mulf %25, %25 : vector<16x128xf32>
    %27 = arith.mulf %26, %20 : vector<16x128xf32>
    %28 = arith.extui %7 : i1 to i32
    %c0_i32_10 = arith.constant 0 : i32
    %29 = arith.cmpi ne, %28, %c0_i32_10 : i32
    scf.if %29 {
      %c0_12 = arith.constant 0 : index
      %c0_13 = arith.constant 0 : index
      %34 = vector.load %arg4[%c0_12, %c0_13] : memref<8x128xf32, #tpu.memory_space<vmem>>, vector<8x128xf32>
      %35 = vector.shape_cast %27 : vector<16x128xf32> to vector<2x8x128xf32>
      %cst_14 = arith.constant dense<0.000000e+00> : vector<8x128xf32>
      %36 = vector.multi_reduction <add>, %35, %cst_14 [0] : vector<2x8x128xf32> to vector<8x128xf32>
      %37 = arith.addf %34, %36 : vector<8x128xf32>
      %c0_15 = arith.constant 0 : index
      %c0_16 = arith.constant 0 : index
      %38 = vector.load %arg4[%c0_15, %c0_16] : memref<8x128xf32, #tpu.memory_space<vmem>>, vector<8x128xf32>
      tpu.vector_store %arg4[%c0_15, %c0_16], %37 {strides = array<i32>} : memref<8x128xf32, #tpu.memory_space<vmem>>, vector<8x128xf32>,
    } else {
    }
    %true = arith.constant true
    %30 = arith.xori %7, %true : i1
    %31 = arith.andi %8, %30 : i1
    %32 = arith.extui %31 : i1 to i32
    %c0_i32_11 = arith.constant 0 : i32
    %33 = arith.cmpi ne, %32, %c0_i32_11 : i32
    scf.if %33 {
      %34 = tpu.iota {dimensions = array<i32: 0>} : vector<16x128xi32>
      %35 = vector.broadcast %5 : i32 to vector<16x128xi32>
      %36 = arith.addi %35, %34 : vector<16x128xi32>
      %c16_i32_12 = arith.constant 16 : i32
      %37 = vector.broadcast %c16_i32_12 : i32 to vector<16x128xi32>
      %38 = arith.cmpi slt, %36, %37 : vector<16x128xi32>
      %cst_13 = arith.constant 0.000000e+00 : f32
      %39 = vector.broadcast %cst_13 : f32 to vector<16x128xf32>
      %40 = arith.select %38, %27, %39 : vector<16x128xi1>, vector<16x128xf32>
      %c0_14 = arith.constant 0 : index
      %c0_15 = arith.constant 0 : index
      %41 = vector.load %arg4[%c0_14, %c0_15] : memref<8x128xf32, #tpu.memory_space<vmem>>, vector<8x128xf32>
      %42 = vector.shape_cast %40 : vector<16x128xf32> to vector<2x8x128xf32>
      %cst_16 = arith.constant dense<0.000000e+00> : vector<8x128xf32>
      %43 = vector.multi_reduction <add>, %42, %cst_16 [0] : vector<2x8x128xf32> to vector<8x128xf32>
      %44 = arith.addf %41, %43 : vector<8x128xf32>
      %c0_17 = arith.constant 0 : index
      %c0_18 = arith.constant 0 : index
      %45 = vector.load %arg4[%c0_17, %c0_18] : memref<8x128xf32, #tpu.memory_space<vmem>>, vector<8x128xf32>
      tpu.vector_store %arg4[%c0_17, %c0_18], %44 {strides = array<i32>} : memref<8x128xf32, #tpu.memory_space<vmem>>, vector<8x128xf32>,
    } else {
    }
    return
  }
  func.func @transform_0(%arg0: i32, %arg1: i32) -> (i32, i32) {
    %c1_i32 = arith.constant 1 : i32
    %0 = arith.muli %arg0, %c1_i32 : i32
    %1 = arith.addi %0, %arg1 : i32
    %c0_i32 = arith.constant 0 : i32
    %2 = arith.minsi %1, %c0_i32 : i32
    %c0_i32_0 = arith.constant 0 : i32
    %c0_i32_1 = arith.constant 0 : i32
    return %2, %c0_i32_0 : i32, i32
  }
  func.func @transform_1(%arg0: i32, %arg1: i32) -> (i32, i32) {
    %c1_i32 = arith.constant 1 : i32
    %0 = arith.muli %arg0, %c1_i32 : i32
    %1 = arith.addi %0, %arg1 : i32
    %c0_i32 = arith.constant 0 : i32
    %2 = arith.minsi %1, %c0_i32 : i32
    %c0_i32_0 = arith.constant 0 : i32
    %c0_i32_1 = arith.constant 0 : i32
    return %2, %c0_i32_0 : i32, i32
  }
  func.func @transform_2(%arg0: i32, %arg1: i32) -> (i32, i32) {
    %c0_i32 = arith.constant 0 : i32
    %c0_i32_0 = arith.constant 0 : i32
    return %arg0, %c0_i32 : i32, i32
  }
}

</mosaic_0001>

<bundles_post_ra>
// kernel: tpu_custom_call.1
= control target key start
LH: loop header
LB: loop body
LE: loop exit
PB: predicated region body
PF: predicated region fallthrough
CT: control target
= control target key end

     0   :  { %7 = vsyncpa [#allocation3], 0  ;;  %s297_s0 = inlined_call_operand.hbm [shape: f32[16,128], index: 0, kind: input, shape index: {}]   ;;  %s298_s1 = inlined_call_operand.hbm [shape: f32[16,128], index: 1, kind: input, shape index: {}]   ;;  %s299_s2 = inlined_call_operand.hbm [shape: f32[8,128], index: 2, kind: output, shape index: {}]  }
   0x1   :  { %8 = vsyncpa [#allocation6], 0 }
   0x2   :  { %9 = vsyncpa [#allocation4], 0  ;;  %s20_s11 = sshll.u32 %s297_s0, 4  ;;  %s268_s12 = smov [#allocation2]   ;;  %s21_s11 = int_to_ptr.hbm [resolvable:$true] %s20_s11 }
   0x3   :  { %s22_s13 = sshll.u32 %s268_s12, 4  ;;  %s39_s16 = sshll.u32 %s298_s1, 4  ;;  %s23_s13 = int_to_ptr.vmem [resolvable:$true] %s22_s13  ;;  %s40_s16 = int_to_ptr.hbm [resolvable:$true] %s39_s16 }
   0x4   :  { %s269_s17 = smov 128   ;;  %s270_s18 = smov 8  }
   0x5   :  { %28 = dma.hbm_to_vmem [thread:$0]  %s21_s11, 256, %s23_s13, [#allocation3], %s269_s17, %s269_s17, %s270_s18  }
   0x6   :  { %s271_s19 = smov [#allocation5]  }
   0x7   :  { %s41_s20 = sshll.u32 %s271_s19, 4  ;;  %s42_s20 = int_to_ptr.vmem [resolvable:$true] %s41_s20 }
   0x8   :  { %47 = dma.hbm_to_vmem [thread:$0]  %s40_s16, 256, %s42_s20, [#allocation6], %s269_s17, %s269_s17, %s270_s18  }
   0x9   :  { %262 = dma.done.wait [#allocation3], 256  }
   0xa   :  { %263 = vsyncadd [#allocation3], 4294967040 }
   0xb   :  { %264 = dma.done.wait [#allocation6], 256  }
   0xc   :  { %265 = vsyncadd [#allocation6], 4294967040  ;;  %v74_v0 = vld [vmem:[#allocation2] sm:$0xff]  ;;  %v75_v1 = vld [vmem:[#allocation2 + $0x8] sm:$0xff]  ;;  %s272_s0 = smov [#allocation7]   ;;  %s157_s23 = sshll.u32 %s299_s2, 4  ;;  %s158_s23 = int_to_ptr.hbm [resolvable:$true] %s157_s23 }
   0xd   :  { %v84_v2 = vand.u32 2147483647, %v74_v0  ;;  %v85_v3 = vand.u32 2147483647, %v75_v1  ;;  %v76_v12 = vld [vmem:[#allocation5] sm:$0xff]  ;;  %v77_v15 = vld [vmem:[#allocation5 + $0x8] sm:$0xff] }
   0xe   :  { %v78_v17 = vmax.f32 %v74_v0, 0.0  ;;  %v80_v18 = vmul.f32 %v76_v12, %v74_v0  ;;  %v79_v21 = vmax.f32 %v75_v1, 0.0  ;;  %v81_v22 = vmul.f32 %v77_v15, %v75_v1  ;;  %s155_s1 = sshll.u32 %s272_s0, 4  ;;  %s156_s1 = int_to_ptr.vmem [resolvable:$true] %s155_s1 }
   0xf   :  { %v86_v4 = vsub.f32 0.0, %v84_v2  ;;  %v87_v5 = vsub.f32 0.0, %v85_v3 }
  0x10   :  { %v82_v26 = vsub.f32 %v78_v17, %v80_v18  ;;  %v83_v29 = vsub.f32 %v79_v21, %v81_v22 }
  0x11   :  { %v88_v6 = vmul.f32 1.442695, %v86_v4  ;;  %v90_v7 = vmul.f32 1.442695, %v87_v5 }
  0x13   :  { %178 = vpow2.f32 %v88_v6 }
  0x14   :  { %180 = vpow2.f32 %v90_v7 }
  0x19   :  { %v179_v8 = vpop.eup %178 }
  0x1a   :  { %v181_v9 = vpop.eup %180  ;;  %v92_v10 = vadd.f32 1.0, %v179_v8  ;;  %v95_v11 = vmul.f32 -0.5, %v179_v8  ;;  %v98_v19 = vand.u32 2147483647, %v179_v8 }
  0x1b   :  { %v101_v13 = vadd.f32 1.0, %v181_v9  ;;  %v104_v14 = vmul.f32 -0.5, %v181_v9  ;;  %v107_v23 = vand.u32 2147483647, %v181_v9 }
  0x1c   :  { %182 = vlog2.f32 %v92_v10  ;;  %v96_v16 = vadd.f32 1.0, %v95_v11  ;;  %vm99_vm0 = vcmp.lt.f32.partialorder %v98_v19, 0.0004427343 }
  0x1d   :  { %184 = vlog2.f32 %v101_v13  ;;  %v105_v20 = vadd.f32 1.0, %v104_v14  ;;  %vm108_vm1 = vcmp.lt.f32.partialorder %v107_v23, 0.0004427343 }
  0x1e   :  { %v97_v24 = vmul.f32 %v179_v8, %v96_v16 }
  0x1f   :  { %v106_v27 = vmul.f32 %v181_v9, %v105_v20 }
  0x22   :  { %v183_v25 = vpop.eup %182 }
  0x23   :  { %v185_v28 = vpop.eup %184  ;;  %v94_v30 = vmul.f32 0.6931472, %v183_v25 }
  0x24   :  { %v103_v31 = vmul.f32 0.6931472, %v185_v28 }
  0x25   :  { %v100_v32 = vsel %vm99_vm0, %v97_v24, %v94_v30 }
  0x26   :  { %v109_v33 = vsel %vm108_vm1, %v106_v27, %v103_v31  ;;  %v110_v34 = vadd.f32 %v100_v32, %v82_v26 }
  0x27   :  { %v111_v35 = vadd.f32 %v109_v33, %v83_v29 }
  0x28   :  { %v112_v36 = vsub.f32 0.0, %v110_v34 }
  0x29   :  { %v113_v37 = vsub.f32 0.0, %v111_v35 }
  0x2a   :  { %v114_v38 = vmul.f32 1.442695, %v112_v36 }
  0x2b   :  { %v116_v39 = vmul.f32 1.442695, %v113_v37 }
  0x2c   :  { %186 = vpow2.f32 %v114_v38 }
  0x2d   :  { %188 = vpow2.f32 %v116_v39 }
  0x32   :  { %v187_v40 = vpop.eup %186 }
  0x33   :  { %v189_v41 = vpop.eup %188  ;;  %v118_v42 = vsub.f32 1.0, %v187_v40 }
  0x34   :  { %v119_v43 = vsub.f32 1.0, %v189_v41 }
  0x35   :  { %v120_v44 = vmul.f32 %v118_v42, %v118_v42 }
  0x36   :  { %v121_v45 = vmul.f32 %v119_v43, %v119_v43 }
  0x37   :  { %v122_v46 = vmul.f32 %v120_v44, %v110_v34 }
  0x38   :  { %v123_v47 = vmul.f32 %v121_v45, %v111_v35 }
  0x3a   :  { %v128_v48 = vadd.f32 %v123_v47, %v122_v46 }
  0x3c   :  { %130 = vst [vmem:[#allocation7] sm:$0xff] %v128_v48 }
  0x3d   :  { %160 = dma.vmem_to_hbm [thread:$0]  %s156_s1, 128, %s158_s23, [#allocation4]  }
  0x3e   :  { %266 = dma.done.wait [#allocation4], 128  }
  0x3f   :  { %267 = vsyncadd [#allocation4], 4294967168 }
  0x40   :  { %165 = vsyncpa [#allocation3], 1 }
  0x41   :  { %166 = vsyncpa [#allocation6], 1 }
  0x42   :  { %167 = vsyncpa [#allocation4], 1 }

</bundles_post_ra>
